<compile_context>
chip_gen: v7x
topology: tpu7x:2x2x1
jax: 0.10.0
libtpu: 0.0.40
codegen_flags: <defaults>
</compile_context>

<pallas_src>
import functools
import math

import jax
import jax.numpy as jnp
from jax import lax
from jax.experimental import pallas as pl
from jax.experimental.pallas import tpu as pltpu


_DEFAULT_VMEM_LIMIT = 48 * 1024 * 1024   # <= v7x 64 MiB physical, with headroom


# --------------------------------------------------------------------------- #
# Pass 1: flash-attention forward -> (o, lse)
# --------------------------------------------------------------------------- #
def _flash_fwd_kernel(q_ref, k_ref, v_ref, o_ref, lse_ref,
                      m_sc, l_sc, acc_sc, *, inv_temperature):
    """Grid = (bh_blocks, q_blocks, k_blocks); k axis is the reduction.

    Blocks:
      q_ref:   (bh, tq, dk)     k_ref: (bh, tk, dk)     v_ref: (bh, tk, dv)
      o_ref:   (bh, tq, dv)     written once, at the last k step
      lse_ref: (bh, tq, 1) f32  log-sum-exp, written at the last k step
    Scratch (f32, persists across the k axis): m_sc/l_sc (bh,tq,1), acc_sc (bh,tq,dv).
    """
    ki = pl.program_id(2)

    @pl.when(ki == 0)
    def _init():
        m_sc[...] = jnp.full(m_sc.shape, -jnp.inf, dtype=m_sc.dtype)
        l_sc[...] = jnp.zeros(l_sc.shape, dtype=l_sc.dtype)
        acc_sc[...] = jnp.zeros(acc_sc.shape, dtype=acc_sc.dtype)

    # Scale Q (dk wide) instead of S (tk wide): far fewer VPU multiplies.
    q = q_ref[...] * inv_temperature
    # QK^T via dot_general contracting head dims directly (no K transpose);
    # operands stay in native dtype (bf16 feeds the MXU), accumulate in f32.
    s = lax.dot_general(q, k_ref[...],
                        dimension_numbers=(((2,), (2,)), ((0,), (0,))),
                        preferred_element_type=jnp.float32)      # (bh, tq, tk)

    m_prev = m_sc[...]
    m_new = jnp.maximum(m_prev, jnp.max(s, axis=-1, keepdims=True))
    alpha = jnp.exp(m_prev - m_new)
    p = jnp.exp(s - m_new)                                        # (bh, tq, tk) f32

    l_new = alpha * l_sc[...] + jnp.sum(p, axis=-1, keepdims=True)
    l_sc[...] = l_new
    m_sc[...] = m_new

    pv = lax.dot_general(p.astype(v_ref.dtype), v_ref[...],
                         dimension_numbers=(((2,), (1,)), ((0,), (0,))),
                         preferred_element_type=jnp.float32)      # (bh, tq, dv)
    acc_new = alpha * acc_sc[...] + pv
    acc_sc[...] = acc_new

    @pl.when(ki == pl.num_programs(2) - 1)
    def _finalize():
        # EUP approximate reciprocal + one Newton step: near-exact, still cheap.
        inv_l = pl.reciprocal(l_new, approx=True)
        inv_l = inv_l * (2.0 - l_new * inv_l)
        o_ref[...] = (acc_new * inv_l).astype(o_ref.dtype)
        lse_ref[...] = m_new + jnp.log(l_new)


# --------------------------------------------------------------------------- #
# Pass 2: tiled recompute of attention probabilities from Q, K, LSE
# --------------------------------------------------------------------------- #
def _attn_probs_kernel(q_ref, k_ref, lse_ref, attn_ref, *, inv_temperature):
    q = q_ref[...] * inv_temperature
    s = lax.dot_general(q, k_ref[...],
                        dimension_numbers=(((2,), (2,)), ((0,), (0,))),
                        preferred_element_type=jnp.float32)      # (bh, tq, tk)
    # exp(S - LSE) is the exact softmax (LSE = rowmax + log(rowsum)).
    attn_ref[...] = jnp.exp(s - lse_ref[...]).astype(attn_ref.dtype)


# --------------------------------------------------------------------------- #
# Tile selection helpers
# --------------------------------------------------------------------------- #
def _pick_seq_tile(n, preferred=256):
    """Divisor of n, multiple of 8 (or full extent), <= preferred."""
    if n <= preferred:
        return n
    start = preferred - (preferred % 8)
    for t in range(start, 0, -8):
        if n % t == 0:
            return t
    return n


def _pick_lane_tile(n, preferred=256):
    """Divisor of n, multiple of 128 (or full extent), <= preferred (lane dim)."""
    if n <= preferred:
        return n
    start = preferred - (preferred % 128)
    for t in range(start, 0, -128):
        if n % t == 0:
            return t
    return n


def _pick_bh_block(bh, n_q_blocks, preferred=8):
    """Divisor of bh, <= preferred; keep >=2 parallel blocks for v7x megacore."""
    cands = [c for c in range(1, bh + 1) if bh % c == 0 and c <= preferred]
    blk = max(cands)
    if n_q_blocks * (bh // blk) < 2 and bh > 1:
        smaller = [c for c in cands if bh // c >= 2]
        if smaller:
            blk = max(smaller)
    return blk


# --------------------------------------------------------------------------- #
# Scaled dot-product attention (eval-mode ScaledDotProductAttention)
# --------------------------------------------------------------------------- #
def flash_sdpa(q, k, v, temperature, *, return_attn=False, attn_dtype=None,
               block_bh=None, block_q=None, block_k=None, block_k_attn=None,
               kv_pipeline_buffers=None, vmem_limit_bytes=_DEFAULT_VMEM_LIMIT):
    """q: (B,H,Lq,dk); k: (B,H,Lk,dk); v: (B,H,Lk,dv) -> (o, attn-or-None)."""
    B, H, Lq, dk = q.shape
    Bk, Hk, Lk, dk2 = k.shape
    Bv, Hv, Lv, dv = v.shape
    assert (Bk, Hk) == (B, H) and (Bv, Hv) == (B, H)
    assert dk2 == dk and Lv == Lk

    BH = B * H
    qf = q.reshape(BH, Lq, dk)
    kf = k.reshape(BH, Lk, dk)
    vf = v.reshape(BH, Lk, dv)

    block_q = block_q or _pick_seq_tile(Lq, 256)
    block_k = block_k or _pick_seq_tile(Lk, 256)
    block_bh = block_bh or _pick_bh_block(BH, Lq // block_q)
    assert Lq % block_q == 0 and Lk % block_k == 0 and BH % block_bh == 0

    inv_temperature = 1.0 / float(temperature)
    grid = (BH // block_bh, Lq // block_q, Lk // block_k)

    def _kv_spec(shape, index_map):
        # Optional deeper buffering for K/V streams (useful on HBM-BW-poor v5e).
        if kv_pipeline_buffers is not None:
            return pl.BlockSpec(shape, index_map,
                                pipeline_mode=pl.Buffered(kv_pipeline_buffers))
        return pl.BlockSpec(shape, index_map)

    in_specs = [
        pl.BlockSpec((block_bh, block_q, dk), lambda g, qi, ki: (g, qi, 0)),
        _kv_spec((block_bh, block_k, dk), lambda g, qi, ki: (g, ki, 0)),
        _kv_spec((block_bh, block_k, dv), lambda g, qi, ki: (g, ki, 0)),
    ]
    out_specs = [
        pl.BlockSpec((block_bh, block_q, dv), lambda g, qi, ki: (g, qi, 0)),
        pl.BlockSpec((block_bh, block_q, 1), lambda g, qi, ki: (g, qi, 0)),
    ]
    out_shape = [
        jax.ShapeDtypeStruct((BH, Lq, dv), q.dtype),
        jax.ShapeDtypeStruct((BH, Lq, 1), jnp.float32),
    ]

    o_flat, lse_flat = pl.pallas_call(
        functools.partial(_flash_fwd_kernel, inv_temperature=inv_temperature),
        out_shape=out_shape,
        grid_spec=pltpu.PrefetchScalarGridSpec(
            num_scalar_prefetch=0,
            grid=grid,
            in_specs=in_specs,
            out_specs=out_specs,
            scratch_shapes=[
                pltpu.VMEM((block_bh, block_q, 1), jnp.float32),    # running max
                pltpu.VMEM((block_bh, block_q, 1), jnp.float32),    # running denom
                pltpu.VMEM((block_bh, block_q, dv), jnp.float32),   # running acc
            ],
        ),
        compiler_params=pltpu.CompilerParams(
            dimension_semantics=("parallel", "parallel", "arbitrary"),
            vmem_limit_bytes=vmem_limit_bytes,
        ),
    )(qf, kf, vf)

    o = o_flat.reshape(B, H, Lq, dv)
    if not return_attn:
        return o, None

    # ---- Pass 2: attention probabilities, tiled over both Lq and Lk -------- #
    block_k_attn = block_k_attn or _pick_lane_tile(Lk, 256)
    assert Lk % block_k_attn == 0
    attn_dtype = attn_dtype or q.dtype
    grid2 = (BH // block_bh, Lq // block_q, Lk // block_k_attn)

    attn_flat = pl.pallas_call(
        functools.partial(_attn_probs_kernel, inv_temperature=inv_temperature),
        out_shape=jax.ShapeDtypeStruct((BH, Lq, Lk), attn_dtype),
        grid_spec=pltpu.PrefetchScalarGridSpec(
            num_scalar_prefetch=0,
            grid=grid2,
            in_specs=[
                pl.BlockSpec((block_bh, block_q, dk), lambda g, qi, ki: (g, qi, 0)),
                pl.BlockSpec((block_bh, block_k_attn, dk), lambda g, qi, ki: (g, ki, 0)),
                pl.BlockSpec((block_bh, block_q, 1), lambda g, qi, ki: (g, qi, 0)),
            ],
            out_specs=pl.BlockSpec((block_bh, block_q, block_k_attn),
                                   lambda g, qi, ki: (g, qi, ki)),
        ),
        compiler_params=pltpu.CompilerParams(
            dimension_semantics=("parallel", "parallel", "parallel"),
            vmem_limit_bytes=vmem_limit_bytes,
        ),
    )(qf, kf, lse_flat)

    return o, attn_flat.reshape(B, H, Lq, Lk)


# --------------------------------------------------------------------------- #
# MultiHeadAttention forward (eval mode)
# --------------------------------------------------------------------------- #
def init_mha_params(key, d_model, n_head, d_k, d_v, dtype=jnp.float32):
    k1, k2, k3, k4, k5, k6 = jax.random.split(key, 6)
    s_in = 1.0 / math.sqrt(d_model)
    s_fc = 1.0 / math.sqrt(n_head * d_v)
    return {
        "w_qs": (jax.random.normal(k1, (d_model, n_head * d_k)) * s_in).astype(dtype),
        "w_ks": (jax.random.normal(k2, (d_model, n_head * d_k)) * s_in).astype(dtype),
        "w_vs": (jax.random.normal(k3, (d_model, n_head * d_v)) * s_in).astype(dtype),
        "fc":   (jax.random.normal(k4, (n_head * d_v, d_model)) * s_fc).astype(dtype),
        "ln_gamma": (1.0 + 0.1 * jax.random.normal(k5, (d_model,))).astype(dtype),
        "ln_beta":  (0.1 * jax.random.normal(k6, (d_model,))).astype(dtype),
    }


def _layer_norm(x, gamma, beta, eps=1e-6):
    mu = jnp.mean(x, axis=-1, keepdims=True)
    var = jnp.mean(jnp.square(x - mu), axis=-1, keepdims=True)
    return (x - mu) * lax.rsqrt(var + eps) * gamma + beta


def multi_head_attention(q, k, v, params, *, n_head, d_k, d_v,
                         sdpa_dtype=None, return_attn=True):
    """MultiHeadAttention.forward (eval mode).  q/k/v: (B, len, d_model).

    sdpa_dtype=jnp.bfloat16 is the recommended production setting (halves K/V
    HBM traffic, doubles MXU throughput); softmax statistics stay f32 either way.
    The module returns attn, so return_attn defaults to True; pure-inference
    callers that drop attn should pass return_attn=False (skips pass 2).
    """
    sz_b, len_q, d_model = q.shape
    residual = jnp.squeeze(q, axis=1) if len_q == 1 else q

    qn = _layer_norm(q, params["ln_gamma"], params["ln_beta"])

    # Projections written directly in (B, H, L, d) order — no materialized
    # (0,2,1,3) transpose copies around the kernel.
    w_qs = params["w_qs"].reshape(d_model, n_head, d_k)
    w_ks = params["w_ks"].reshape(d_model, n_head, d_k)
    w_vs = params["w_vs"].reshape(d_model, n_head, d_v)
    qp = jnp.einsum("bld,dhk->bhlk", qn, w_qs)
    kp = jnp.einsum("bld,dhk->bhlk", k, w_ks)
    vp = jnp.einsum("bld,dhk->bhlk", v, w_vs)
    if sdpa_dtype is not None:
        qp = qp.astype(sdpa_dtype)
        kp = kp.astype(sdpa_dtype)
        vp = vp.astype(sdpa_dtype)

    # TODO(synk): with the module's tiny head dims (d_k=d_v=8) the lane dim is
    # mostly padding; for such shapes a lane-packed layout (or plain XLA) would
    # be faster — kept on the Pallas path here for generality.
    o, attn = flash_sdpa(qp, kp, vp, temperature=d_k ** 0.5,
                         return_attn=return_attn, attn_dtype=q.dtype)
    o = o.astype(q.dtype)

    # Output projection consumes the kernel's (B, H, Lq, dv) layout directly.
    w_fc = params["fc"].reshape(n_head, d_v, d_model)
    out = jnp.einsum("bhqd,hdm->bqm", o, w_fc)          # dropout: eval identity
    if len_q == 1:
        out = out.reshape(sz_b, d_model)
    out = out + residual
    return out, attn


def _mha_reference(q, k, v, params, *, n_head, d_k, d_v):
    sz_b, len_q, _ = q.shape
    len_k, len_v = k.shape[1], v.shape[1]
    residual = jnp.squeeze(q, axis=1) if len_q == 1 else q
    qn = _layer_norm(q, params["ln_gamma"], params["ln_beta"])
    qp = (qn @ params["w_qs"]).reshape(sz_b, len_q, n_head, d_k).transpose(0, 2, 1, 3)
    kp = (k @ params["w_ks"]).reshape(sz_b, len_k, n_head, d_k).transpose(0, 2, 1, 3)
    vp = (v @ params["w_vs"]).reshape(sz_b, len_v, n_head, d_v).transpose(0, 2, 1, 3)
    s = jnp.einsum("bhqd,bhkd->bhqk", qp / (d_k ** 0.5), kp)
    attn = jax.nn.softmax(s, axis=-1)
    o = jnp.einsum("bhqk,bhkd->bhqd", attn, vp).transpose(0, 2, 1, 3)
    o = o.reshape(sz_b, n_head * d_v) if len_q == 1 else o.reshape(sz_b, len_q, n_head * d_v)
    return o @ params["fc"] + residual, attn


if __name__ == "__main__":
    # --- Module-consistent small shapes -------------------------------------
    B, L, d_model, n_head, d_k, d_v = 2, 8, 32, 4, 8, 8
    key = jax.random.PRNGKey(0)
    kp_, kq_, kk_, kv_ = jax.random.split(key, 4)
    params = init_mha_params(kp_, d_model, n_head, d_k, d_v)
    q = jax.random.normal(kq_, (B, L, d_model), dtype=jnp.float32)
    k = jax.random.normal(kk_, (B, L, d_model), dtype=jnp.float32)
    v = jax.random.normal(kv_, (B, L, d_model), dtype=jnp.float32)

    ref_out, ref_attn = _mha_reference(q, k, v, params, n_head=n_head, d_k=d_k, d_v=d_v)

    # (A) f32 SDPA path — tight correctness check
    out, attn = multi_head_attention(q, k, v, params, n_head=n_head, d_k=d_k, d_v=d_v)
    out = jax.block_until_ready(out)
    attn = jax.block_until_ready(attn)
    assert out.shape == (B, L, d_model) and attn.shape == (B, n_head, L, L)
    assert jnp.allclose(out, ref_out, atol=5e-3, rtol=5e-3), "MHA f32 output mismatch"
    assert jnp.allclose(attn, ref_attn, atol=5e-3, rtol=5e-3), "MHA f32 attn mismatch"

    # (B) bf16 SDPA path (recommended production setting) — loose check
    out_bf, attn_bf = multi_head_attention(q, k, v, params, n_head=n_head,
                                           d_k=d_k, d_v=d_v, sdpa_dtype=jnp.bfloat16)
    out_bf = jax.block_until_ready(out_bf)
    assert jnp.allclose(out_bf, ref_out, atol=6e-2, rtol=6e-2), "MHA bf16 output mismatch"
    assert jnp.allclose(attn_bf.astype(jnp.float32), ref_attn,
                        atol=3e-2, rtol=3e-2), "MHA bf16 attn mismatch"

    # (C) Tiled flash path: multiple K blocks + tiled pass-2 attn, bf16 operands
    B2, H2, L2, D2 = 2, 2, 256, 64
    kq2, kk2, kv2 = jax.random.split(jax.random.PRNGKey(1), 3)
    q2 = jax.random.normal(kq2, (B2, H2, L2, D2), dtype=jnp.float32).astype(jnp.bfloat16)
    k2 = jax.random.normal(kk2, (B2, H2, L2, D2), dtype=jnp.float32).astype(jnp.bfloat16)
    v2 = jax.random.normal(kv2, (B2, H2, L2, D2), dtype=jnp.float32).astype(jnp.bfloat16)
    o2, a2 = flash_sdpa(q2, k2, v2, temperature=D2 ** 0.5, return_attn=True,
                        attn_dtype=jnp.float32,
                        block_bh=2, block_q=128, block_k=128, block_k_attn=128)
    o2 = jax.block_until_ready(o2)
    a2 = jax.block_until_ready(a2)
    q2f, k2f, v2f = (x.astype(jnp.float32) for x in (q2, k2, v2))
    s2 = jnp.einsum("bhqd,bhkd->bhqk", q2f / (D2 ** 0.5), k2f)
    a2_ref = jax.nn.softmax(s2, axis=-1)
    o2_ref = jnp.einsum("bhqk,bhkd->bhqd", a2_ref, v2f)
    assert jnp.allclose(o2.astype(jnp.float32), o2_ref, atol=2e-2, rtol=2e-2), \
        "flash SDPA output mismatch"
    assert jnp.allclose(a2, a2_ref, atol=1e-2, rtol=1e-2), "flash SDPA attn mismatch"

    print("KERNEL_OK")
</pallas_src>

<mosaic_0001>
module attributes {stable_mosaic.version = 11 : i64} {
  func.func @_flash_fwd_kernel(%arg0: i32, %arg1: i32, %arg2: i32, %arg3: memref<4x8x8xf32, #tpu.memory_space<vmem>>, %arg4: memref<4x8x8xf32, #tpu.memory_space<vmem>>, %arg5: memref<4x8x8xf32, #tpu.memory_space<vmem>>, %arg6: memref<4x8x8xf32, #tpu.memory_space<vmem>>, %arg7: memref<4x8x1xf32, #tpu.memory_space<vmem>>, %arg8: memref<4x8x1xf32, #tpu.memory_space<vmem>>, %arg9: memref<4x8x1xf32, #tpu.memory_space<vmem>>, %arg10: memref<4x8x8xf32, #tpu.memory_space<vmem>>) attributes {dimension_semantics = [#tpu.dimension_semantics<parallel>, #tpu.dimension_semantics<parallel>, #tpu.dimension_semantics<arbitrary>], iteration_bounds = array<i64: 2, 1, 1>, scalar_prefetch = 0 : i64, scratch_operands = 3 : i64, tpu.core_type = #tpu.core_type<tc>, window_params = [{transform_indices = @transform_0, window_bounds = array<i64: 4, 8, 8>}, {transform_indices = @transform_1, window_bounds = array<i64: 4, 8, 8>}, {transform_indices = @transform_2, window_bounds = array<i64: 4, 8, 8>}, {transform_indices = @transform_3, window_bounds = array<i64: 4, 8, 8>}, {transform_indices = @transform_4, window_bounds = array<i64: 4, 8, 1>}]} {
    %c0_i32 = arith.constant 0 : i32
    %0 = arith.cmpi eq, %arg2, %c0_i32 : i32
    %1 = arith.extui %0 : i1 to i32
    %c0_i32_0 = arith.constant 0 : i32
    %2 = arith.cmpi ne, %1, %c0_i32_0 : i32
    scf.if %2 {
      %cst_33 = arith.constant 0xFF800000 : f32
      %34 = vector.broadcast %cst_33 : f32 to vector<4x8x1xf32>
      %c0_34 = arith.constant 0 : index
      %c0_35 = arith.constant 0 : index
      %c0_36 = arith.constant 0 : index
      %35 = vector.load %arg8[%c0_34, %c0_35, %c0_36] : memref<4x8x1xf32, #tpu.memory_space<vmem>>, vector<4x8x1xf32>
      tpu.vector_store %arg8[%c0_34, %c0_35, %c0_36], %34 {strides = array<i32>} : memref<4x8x1xf32, #tpu.memory_space<vmem>>, vector<4x8x1xf32>,
      %cst_37 = arith.constant 0.000000e+00 : f32
      %36 = vector.broadcast %cst_37 : f32 to vector<4x8x1xf32>
      %c0_38 = arith.constant 0 : index
      %c0_39 = arith.constant 0 : index
      %c0_40 = arith.constant 0 : index
      %37 = vector.load %arg9[%c0_38, %c0_39, %c0_40] : memref<4x8x1xf32, #tpu.memory_space<vmem>>, vector<4x8x1xf32>
      tpu.vector_store %arg9[%c0_38, %c0_39, %c0_40], %36 {strides = array<i32>} : memref<4x8x1xf32, #tpu.memory_space<vmem>>, vector<4x8x1xf32>,
      %cst_41 = arith.constant 0.000000e+00 : f32
      %38 = vector.broadcast %cst_41 : f32 to vector<4x8x8xf32>
      %c0_42 = arith.constant 0 : index
      %c0_43 = arith.constant 0 : index
      %c0_44 = arith.constant 0 : index
      %39 = vector.load %arg10[%c0_42, %c0_43, %c0_44] : memref<4x8x8xf32, #tpu.memory_space<vmem>>, vector<4x8x8xf32>
      tpu.vector_store %arg10[%c0_42, %c0_43, %c0_44], %38 {strides = array<i32>} : memref<4x8x8xf32, #tpu.memory_space<vmem>>, vector<4x8x8xf32>,
    } else {
    }
    %c0 = arith.constant 0 : index
    %c0_1 = arith.constant 0 : index
    %c0_2 = arith.constant 0 : index
    %3 = vector.load %arg3[%c0, %c0_1, %c0_2] : memref<4x8x8xf32, #tpu.memory_space<vmem>>, vector<4x8x8xf32>
    %cst = arith.constant 0.353553385 : f32
    %4 = vector.broadcast %cst : f32 to vector<4x8x8xf32>
    %5 = arith.mulf %3, %4 : vector<4x8x8xf32>
    %c0_3 = arith.constant 0 : index
    %c0_4 = arith.constant 0 : index
    %c0_5 = arith.constant 0 : index
    %6 = vector.load %arg4[%c0_3, %c0_4, %c0_5] : memref<4x8x8xf32, #tpu.memory_space<vmem>>, vector<4x8x8xf32>
    %cst_6 = arith.constant dense<0.000000e+00> : vector<4x8x8xf32>
    %7 = tpu.matmul %5, %6, %cst_6 {dimension_numbers = #tpu.dot_dimension_numbers<[2], [2], [1], [1], [0, 0, 0, 1, 1, 1], [0], [0]>} : vector<4x8x8xf32>, vector<4x8x8xf32>, vector<4x8x8xf32> -> vector<4x8x8xf32>
    %c0_7 = arith.constant 0 : index
    %c0_8 = arith.constant 0 : index
    %c0_9 = arith.constant 0 : index
    %8 = vector.load %arg8[%c0_7, %c0_8, %c0_9] : memref<4x8x1xf32, #tpu.memory_space<vmem>>, vector<4x8x1xf32>
    %cst_10 = arith.constant dense<0xFF800000> : vector<4x8xf32>
    %9 = vector.multi_reduction <maximumf>, %7, %cst_10 [2] : vector<4x8x8xf32> to vector<4x8xf32>
    %10 = vector.shape_cast %9 : vector<4x8xf32> to vector<4x8x1xf32>
    %11 = arith.maximumf %8, %10 : vector<4x8x1xf32>
    %12 = arith.subf %8, %11 : vector<4x8x1xf32>
    %13 = math.exp %12 : vector<4x8x1xf32>
    %14 = vector.broadcast %11 : vector<4x8x1xf32> to vector<4x8x8xf32>
    %15 = arith.subf %7, %14 : vector<4x8x8xf32>
    %16 = math.exp %15 : vector<4x8x8xf32>
    %c0_11 = arith.constant 0 : index
    %c0_12 = arith.constant 0 : index
    %c0_13 = arith.constant 0 : index
    %17 = vector.load %arg9[%c0_11, %c0_12, %c0_13] : memref<4x8x1xf32, #tpu.memory_space<vmem>>, vector<4x8x1xf32>
    %18 = arith.mulf %13, %17 : vector<4x8x1xf32>
    %cst_14 = arith.constant dense<0.000000e+00> : vector<4x8xf32>
    %19 = vector.multi_reduction <add>, %16, %cst_14 [2] : vector<4x8x8xf32> to vector<4x8xf32>
    %20 = vector.shape_cast %19 : vector<4x8xf32> to vector<4x8x1xf32>
    %21 = arith.addf %18, %20 : vector<4x8x1xf32>
    %c0_15 = arith.constant 0 : index
    %c0_16 = arith.constant 0 : index
    %c0_17 = arith.constant 0 : index
    %22 = vector.load %arg9[%c0_15, %c0_16, %c0_17] : memref<4x8x1xf32, #tpu.memory_space<vmem>>, vector<4x8x1xf32>
    tpu.vector_store %arg9[%c0_15, %c0_16, %c0_17], %21 {strides = array<i32>} : memref<4x8x1xf32, #tpu.memory_space<vmem>>, vector<4x8x1xf32>,
    %c0_18 = arith.constant 0 : index
    %c0_19 = arith.constant 0 : index
    %c0_20 = arith.constant 0 : index
    %23 = vector.load %arg8[%c0_18, %c0_19, %c0_20] : memref<4x8x1xf32, #tpu.memory_space<vmem>>, vector<4x8x1xf32>
    tpu.vector_store %arg8[%c0_18, %c0_19, %c0_20], %11 {strides = array<i32>} : memref<4x8x1xf32, #tpu.memory_space<vmem>>, vector<4x8x1xf32>,
    %c0_21 = arith.constant 0 : index
    %c0_22 = arith.constant 0 : index
    %c0_23 = arith.constant 0 : index
    %24 = vector.load %arg5[%c0_21, %c0_22, %c0_23] : memref<4x8x8xf32, #tpu.memory_space<vmem>>, vector<4x8x8xf32>
    %cst_24 = arith.constant dense<0.000000e+00> : vector<4x8x8xf32>
    %25 = tpu.matmul %16, %24, %cst_24 {dimension_numbers = #tpu.dot_dimension_numbers<[2], [1], [1], [2], [0, 0, 0, 1, 1, 2], [0], [0]>} : vector<4x8x8xf32>, vector<4x8x8xf32>, vector<4x8x8xf32> -> vector<4x8x8xf32>
    %c0_25 = arith.constant 0 : index
    %c0_26 = arith.constant 0 : index
    %c0_27 = arith.constant 0 : index
    %26 = vector.load %arg10[%c0_25, %c0_26, %c0_27] : memref<4x8x8xf32, #tpu.memory_space<vmem>>, vector<4x8x8xf32>
    %27 = vector.broadcast %13 : vector<4x8x1xf32> to vector<4x8x8xf32>
    %28 = arith.mulf %27, %26 : vector<4x8x8xf32>
    %29 = arith.addf %28, %25 : vector<4x8x8xf32>
    %c0_28 = arith.constant 0 : index
    %c0_29 = arith.constant 0 : index
    %c0_30 = arith.constant 0 : index
    %30 = vector.load %arg10[%c0_28, %c0_29, %c0_30] : memref<4x8x8xf32, #tpu.memory_space<vmem>>, vector<4x8x8xf32>
    tpu.vector_store %arg10[%c0_28, %c0_29, %c0_30], %29 {strides = array<i32>} : memref<4x8x8xf32, #tpu.memory_space<vmem>>, vector<4x8x8xf32>,
    %c0_i32_31 = arith.constant 0 : i32
    %31 = arith.cmpi eq, %arg2, %c0_i32_31 : i32
    %32 = arith.extui %31 : i1 to i32
    %c0_i32_32 = arith.constant 0 : i32
    %33 = arith.cmpi ne, %32, %c0_i32_32 : i32
    scf.if %33 {
      %34 = tpu.reciprocal %21 {approx = true} : vector<4x8x1xf32> -> vector<4x8x1xf32>
      %35 = arith.mulf %21, %34 : vector<4x8x1xf32>
      %cst_33 = arith.constant 2.000000e+00 : f32
      %36 = vector.broadcast %cst_33 : f32 to vector<4x8x1xf32>
      %37 = arith.subf %36, %35 : vector<4x8x1xf32>
      %38 = arith.mulf %34, %37 : vector<4x8x1xf32>
      %39 = vector.broadcast %38 : vector<4x8x1xf32> to vector<4x8x8xf32>
      %40 = arith.mulf %29, %39 : vector<4x8x8xf32>
      %c0_34 = arith.constant 0 : index
      %c0_35 = arith.constant 0 : index
      %c0_36 = arith.constant 0 : index
      %41 = vector.load %arg6[%c0_34, %c0_35, %c0_36] : memref<4x8x8xf32, #tpu.memory_space<vmem>>, vector<4x8x8xf32>
      tpu.vector_store %arg6[%c0_34, %c0_35, %c0_36], %40 {strides = array<i32>} : memref<4x8x8xf32, #tpu.memory_space<vmem>>, vector<4x8x8xf32>,
      %42 = math.log %21 : vector<4x8x1xf32>
      %43 = arith.addf %11, %42 : vector<4x8x1xf32>
      %c0_37 = arith.constant 0 : index
      %c0_38 = arith.constant 0 : index
      %c0_39 = arith.constant 0 : index
      %44 = vector.load %arg7[%c0_37, %c0_38, %c0_39] : memref<4x8x1xf32, #tpu.memory_space<vmem>>, vector<4x8x1xf32>
      tpu.vector_store %arg7[%c0_37, %c0_38, %c0_39], %43 {strides = array<i32>} : memref<4x8x1xf32, #tpu.memory_space<vmem>>, vector<4x8x1xf32>,
    } else {
    }
    return
  }
  func.func @transform_0(%arg0: i32, %arg1: i32, %arg2: i32) -> (i32, i32, i32) {
    %c0_i32 = arith.constant 0 : i32
    %c0_i32_0 = arith.constant 0 : i32
    return %arg0, %arg1, %c0_i32 : i32, i32, i32
  }
  func.func @transform_1(%arg0: i32, %arg1: i32, %arg2: i32) -> (i32, i32, i32) {
    %c0_i32 = arith.constant 0 : i32
    %c0_i32_0 = arith.constant 0 : i32
    return %arg0, %arg2, %c0_i32 : i32, i32, i32
  }
  func.func @transform_2(%arg0: i32, %arg1: i32, %arg2: i32) -> (i32, i32, i32) {
    %c0_i32 = arith.constant 0 : i32
    %c0_i32_0 = arith.constant 0 : i32
    return %arg0, %arg2, %c0_i32 : i32, i32, i32
  }
  func.func @transform_3(%arg0: i32, %arg1: i32, %arg2: i32) -> (i32, i32, i32) {
    %c0_i32 = arith.constant 0 : i32
    %c0_i32_0 = arith.constant 0 : i32
    return %arg0, %arg1, %c0_i32 : i32, i32, i32
  }
  func.func @transform_4(%arg0: i32, %arg1: i32, %arg2: i32) -> (i32, i32, i32) {
    %c0_i32 = arith.constant 0 : i32
    %c0_i32_0 = arith.constant 0 : i32
    return %arg0, %arg1, %c0_i32 : i32, i32, i32
  }
}

</mosaic_0001>

<bundles_post_ra>
// kernel: tpu_custom_call.1
= control target key start
LH: loop header
LB: loop body
LE: loop exit
PB: predicated region body
PF: predicated region fallthrough
CT: control target
= control target key end

     0   :  { %s2216_s0 = inlined_call_operand.hbm [shape: f32[8,8,8], index: 0, kind: input, shape index: {}]   ;;  %s2217_s1 = inlined_call_operand.hbm [shape: f32[8,8,8], index: 1, kind: input, shape index: {}]   ;;  %s2218_s2 = inlined_call_operand.hbm [shape: f32[8,8,8], index: 2, kind: input, shape index: {}]   ;;  %s2219_s3 = inlined_call_operand.hbm [shape: f32[8,8,8], index: 3, kind: output, shape index: {0}]   ;;  %s2220_s4 = inlined_call_operand.vmem [shape: f32[8,8,1], index: 4, kind: output, shape index: {1}]  }
   0x1   :  { %2232 = sst [smem:[#allocation19_spill]] %s2217_s1 }
   0x2   :  { %10 = vsyncpa [#allocation6], 0 }
   0x3   :  { %12 = vsyncpa [#allocation6 + $0x1], 0 }
   0x4   :  { %13 = vsyncpa [#allocation9], 0 }
   0x5   :  { %15 = vsyncpa [#allocation9 + $0x1], 0 }
   0x6   :  { %16 = vsyncpa [#allocation7], 0 }
   0x7   :  { %18 = vsyncpa [#allocation7 + $0x1], 0  ;;  %s1796_s15 = smov 0   ;;  %s1798_s16 = smov 0  }
   0x8   :  { %s1800_s17 = smov 0   ;;  %s1802_s18 = smov 0  }
   0x9   :  { %s1804_s19 = smov 0   ;;  %s1806_s20 = smov 0  }
   0xa LB: > { %2233 = sst [smem:[#allocation15_spill]] %s1753_s19  ;;  %s1827_s21 = sadd.s32 4294967295, %s1757_s20   ;;  %s1757_s20 = sphi %s1806_s20, %s24_s20   ;;  %s1753_s19 = sphi %s1804_s19, %s2258_s19   ;;  %s1749_s18 = sphi %s1802_s18, %s2257_s18   ;;  %s1745_s17 = sphi %s1800_s17, %s2261_s17   ;;  %s1741_s16 = sphi %s1798_s16, %s2260_s16   ;;  %s1737_s15 = sphi %s1796_s15, %s2259_s15  }
   0xb   : > { %2234 = sst [smem:[#allocation16_spill]] %s1757_s20  ;;  %s1371_s22 = sadd.s32 4294967294, %s1757_s20  }
   0xc   : > { %s43_s23 = sadd.s32 1, %s1753_s19  ;;  %s52_s24 = sadd.s32 1, %s1745_s17 }
   0xd   : > { %p45_p0 = scmp.ge.s32.totalorder %s43_s23, 2  ;;  %p59_p1 = scmp.ne.s32.totalorder %s1745_s17, %s1741_s16 }
   0xe   : > { %p60_p2 = scmp.eq.s32.totalorder %s1757_s20, 0  ;;  %p65_p3 = scmp.ne.s32.totalorder %s1741_s16, %s1737_s15 }
   0xf   : > { %s2263_s23 = smov (%p45_p0, %s43_s23), 0  ;;  %p66_p5 = scmp.eq.s32.totalorder %s1827_s21, 0 }
  0x10   : > { %2235 = sst [smem:[#allocation17_spill]] %s2263_s23  ;;  %p1839_p4 = por %p60_p2, %p59_p1 }
  0x11   : > { %s47_s26 = ssub.s32 %s1753_s19, %s2263_s23  ;;  %p147_p6 = scmp.eq.s32.totalorder %s1827_s21, 1 }
  0x12   : > { %p50_p7 = scmp.eq.s32.totalorder %s47_s26, 0  ;;  %p1847_p8 = por %p66_p5, %p65_p3 }
  0x13   : > { %p1851_p9 = por %p147_p6, %p59_p1  ;;  %p153_p10 = scmp.eq.s32.totalorder %s1371_s22, 1 }
  0x14   : > { %s2237_s27 = scalar_select %p1847_p8, 1, 0 }
  0x15   : > { %s2238_s28 = scalar_select %p1851_p9, 1, 0 }
  0x16   : > { %s1856_s29 = scalar_select %p50_p7, %s1745_s17, %s52_s24  }
  0x17   : > { %p1858_p11 = por %p153_p10, %p65_p3  ;;  %p1489_p13 = scmp.lt.s32.totalorder %s1757_s20, 2 }
  0x18   : > { %2239 = sst [smem:[#allocation18_spill]] %s1856_s29  ;;  %s2221_s5 = sand.u32 1, %s1745_s17  }
  0x19   : > { %s2240_s30 = scalar_select %p1858_p11, 1, 0 }
  0x1a   : > { %s1867_s6 = sshll.u32 %s2221_s5, 5  ;;  %s1870_s7 = sshll.u32 %s1753_s19, 9 }
  0x1b   : > { %p1874_p0 = pnand %p1489_p13, %p1839_p4  ;;  %s223_s9 = sand.u32 1, %s1757_s20  }
  0x1c   : > { %s2242_s1 = sld [smem:[#allocation19_spill]]  ;;  %s227_s13 = scalar_lea.vmem [#allocation8], %s1867_s6 }
  0x1d   : > { %s235_s14 = sshll.u32 %s227_s13, 4  ;;  %s1890_s22 = scalar_lea.sflag [#allocation9], %s223_s9  ;;  %s1887_s14 = int_to_ptr.vmem [resolvable:$true] %s235_s14 }
  0x1e   : > { %p1896_p4 = pneg %p1874_p0 }
  0x22   : > { %s1883_s12 = scalar_lea.hbm %s2242_s1, %s1870_s7  ;;  %s1586_s11 = scalar_lea.hbm %s2242_s1, 1024 }
  0x23   : > { %s1581_s24 = scalar_lea.hbm %s1883_s12, 512  ;;  %p1587_p7 = scmp.lt.u32.totalorder %s1883_s12, %s2242_s1 }
  0x24   : > { %p1582_p3 = scmp.ne.s32.totalorder %s1883_s12, %s1581_s24  ;;  %p1588_p10 = scmp.lt.u32.totalorder %s1586_s11, %s1581_s24 }
  0x25   : > { %p1590_p12 = scmp.lt.u32.totalorder %s1581_s24, %s1883_s12 }
  0x26   : > { %p1584_p5 = pnand %p1896_p4, %p1582_p3  ;;  %p1589_p13 = por %p1588_p10, %p1587_p7 }
  0x28   : > { %p1585_p6 = pneg %p1584_p5  ;;  %p1591_p1 = por %p1590_p12, %p1589_p13 }
  0x2a   : > { %p1592_p2 = pnand %p1591_p1, %p1585_p6 }
  0x2c   : > { %1595 = shalt.err (!%p1592_p2)
}
  0x2d   : > { %s1596_s9 = scalar_lea.vmem %s1887_s14, 512  ;;  %s1759_s26 = smov [#allocation8]  }
  0x2e   : > { %p1597_p3 = scmp.ne.s32.totalorder %s1887_s14, %s1596_s9  ;;  %s1601_s10 = sshll.u32 %s1759_s26, 4  ;;  %s1602_s10 = int_to_ptr.vmem [resolvable:$false] %s1601_s10 }
  0x2f   : > { %s1603_s5 = scalar_lea.vmem %s1602_s10, 1024  ;;  %p1604_p9 = scmp.lt.s32.totalorder %s1887_s14, %s1602_s10 }
  0x30   : > { %p1599_p5 = pnand %p1597_p3, %p1896_p4  ;;  %p1605_p8 = scmp.lt.s32.totalorder %s1603_s5, %s1596_s9 }
  0x32   : > { %p1600_p11 = pneg %p1599_p5  ;;  %p1606_p7 = por %p1605_p8, %p1604_p9 }
  0x34   : > { %p1607_p10 = pnand %p1606_p7, %p1600_p11 }
  0x36   : > { %1610 = shalt.err (!%p1607_p10)
}
  0x37   : > { %s2224_s24 = smov 128   ;;  %s2226_s11 = smov 8  }
  0x38   : > { %1481 = dma.hbm_to_vmem [thread:$0]  (!%p1874_p0), %s1883_s12, 512, %s1887_s14, %s1890_s22, %s2224_s24, %s2224_s24, %s2226_s11  }
  0x39   : > { %p2244_p8 = scmp.lt.s32.totalorder %s1757_s20, 3  ;;  %p2245_p9 = scmp.ge.s32.totalorder %s1757_s20, 1 }
  0x3a   : > { %s1935_s10 = scalar_lea.hbm %s2216_s0, %s1870_s7  ;;  %s205_s5 = scalar_lea.vmem [#allocation5], %s1867_s6 }
  0x3b   : > { %p1927_p11 = pnand %p2245_p9, %p2244_p8  ;;  %s213_s1 = sshll.u32 %s205_s5, 4  ;;  %s1938_s1 = int_to_ptr.vmem [resolvable:$true] %s213_s1 }
  0x3c   : > { %s1944_s24 = scalar_lea.hbm %s2218_s2, %s1870_s7  ;;  %s2247_s11 = sand.u32 1, %s1745_s17  }
  0x3d   : > { %s2246_s13 = scalar_select %p1927_p11, 1, 0 }
  0x3e   : > { %s1948_s23 = scalar_lea.sflag [#allocation6], %s2247_s11  ;;  %s1611_s19 = scalar_lea.hbm %s1935_s10, 512 }
  0x3f   : > { %p1612_p12 = scmp.ne.s32.totalorder %s1935_s10, %s1611_s19  ;;  %s1616_s29 = scalar_lea.hbm %s2216_s0, 1024 }
  0x40   : > { %p1617_p6 = scmp.lt.u32.totalorder %s1935_s10, %s2216_s0  ;;  %p1618_p13 = scmp.lt.u32.totalorder %s1616_s29, %s1611_s19 }
  0x41   : > { %p1614_p1 = pnand %p1612_p12, %p1896_p4  ;;  %p1620_p5 = scmp.lt.u32.totalorder %s1611_s19, %s1935_s10 }
  0x42   : > { %p1619_p3 = por %p1618_p13, %p1617_p6 }
  0x43   : > { %p1615_p2 = pneg %p1614_p1 }
  0x44   : > { %p1621_p7 = por %p1620_p5, %p1619_p3 }
  0x46   : > { %p1622_p10 = pnand %p1621_p7, %p1615_p2 }
  0x48   : > { %1625 = shalt.err (!%p1622_p10)
}
  0x49   : > { %s1626_s7 = scalar_lea.vmem %s1938_s1, 512  ;;  %s1762_s11 = smov [#allocation5]  }
  0x4a   : > { %p1627_p8 = scmp.ne.s32.totalorder %s1938_s1, %s1626_s7  ;;  %s1631_s12 = sshll.u32 %s1762_s11, 4  ;;  %s1632_s12 = int_to_ptr.vmem [resolvable:$false] %s1631_s12 }
  0x4b   : > { %s1633_s20 = scalar_lea.vmem %s1632_s12, 1024  ;;  %p1634_p1 = scmp.lt.s32.totalorder %s1938_s1, %s1632_s12 }
  0x4c   : > { %p1629_p9 = pnand %p1627_p8, %p1896_p4  ;;  %p1635_p11 = scmp.lt.s32.totalorder %s1633_s20, %s1626_s7 }
  0x4e   : > { %p1630_p12 = pneg %p1629_p9  ;;  %p1636_p6 = por %p1635_p11, %p1634_p1 }
  0x50   : > { %p1637_p13 = pnand %p1636_p6, %p1630_p12 }
  0x52   : > { %1640 = shalt.err (!%p1637_p13)
}
  0x53   : > { %s2248_s19 = smov 8   ;;  %s2249_s29 = smov 128  }
  0x54   : > { %1478 = dma.hbm_to_vmem [thread:$0]  (!%p1874_p0), %s1935_s10, 512, %s1938_s1, %s1948_s23, %s2249_s29, %s2249_s29, %s2248_s19  }
  0x55   : > { %s249_s14 = scalar_lea.vmem [#allocation10], %s1867_s6  ;;  %s1641_s26 = scalar_lea.hbm %s1944_s24, 512 }
  0x56   : > { %s257_s9 = sshll.u32 %s249_s14, 4  ;;  %p1642_p11 = scmp.ne.s32.totalorder %s1944_s24, %s1641_s26  ;;  %s1976_s9 = int_to_ptr.vmem [resolvable:$true] %s257_s9 }
  0x57   : > { %s1646_s11 = scalar_lea.hbm %s2218_s2, 1024  ;;  %p1647_p5 = scmp.lt.u32.totalorder %s1944_s24, %s2218_s2 }
  0x58   : > { %p1644_p2 = pnand %p1642_p11, %p1896_p4  ;;  %p1648_p7 = scmp.lt.u32.totalorder %s1646_s11, %s1641_s26 }
  0x59   : > { %p1650_p8 = scmp.lt.u32.totalorder %s1641_s26, %s1944_s24 }
  0x5a   : > { %p1645_p3 = pneg %p1644_p2  ;;  %p1649_p10 = por %p1648_p7, %p1647_p5 }
  0x5c   : > { %p1651_p9 = por %p1650_p8, %p1649_p10 }
  0x5e   : > { %p1652_p12 = pnand %p1651_p9, %p1645_p3 }
  0x60   : > { %1655 = shalt.err (!%p1652_p12)
}
  0x61   : > { %s1656_s1 = scalar_lea.vmem %s1976_s9, 512  ;;  %s1763_s23 = smov [#allocation10]  }
  0x62   : > { %p1657_p1 = scmp.ne.s32.totalorder %s1976_s9, %s1656_s1  ;;  %s1661_s6 = sshll.u32 %s1763_s23, 4  ;;  %s1662_s6 = int_to_ptr.vmem [resolvable:$false] %s1661_s6 }
  0x63   : > { %s1663_s10 = scalar_lea.vmem %s1662_s6, 1024  ;;  %p1664_p11 = scmp.lt.s32.totalorder %s1976_s9, %s1662_s6 }
  0x64   : > { %p1659_p6 = pnand %p1657_p1, %p1896_p4  ;;  %p1665_p2 = scmp.lt.s32.totalorder %s1663_s10, %s1656_s1 }
  0x66   : > { %p1660_p13 = pneg %p1659_p6  ;;  %p1666_p5 = por %p1665_p2, %p1664_p11 }
  0x68   : > { %p1667_p7 = pnand %p1666_p5, %p1660_p13 }
  0x6a   : > { %1670 = shalt.err (!%p1667_p7)
}
  0x6b   : > { %1484 = dma.hbm_to_vmem [thread:$0]  (!%p1874_p0), %s1944_s24, 512, %s1976_s9, %s1890_s22, %s2249_s29, %s2249_s29, %s2248_s19  }
  0x6c   : > { %p2250_p4 = scmp.ne.s32.totalorder %s2246_s13, 0 }
  0x6d   : > { %s2006_s25 = sand.u32 (!%p2250_p4), 1, %s1741_s16   ;;  %p2251_p3 = scmp.ne.s32.totalorder (!%p2250_p4), %s2237_s27, 0 }
  0x6e   : > { %269 = sbr.rel (%p2250_p4) target bundleno = 946 (0x3b2), region = 32  ;;  %s2009_s14 = sshll.u32 (!%p2250_p4), %s2006_s25, 5 }
  0x6f   : > { %s272_s8 = scalar_lea.sflag (!%p2250_p4), [#allocation6], %s2006_s25  ;;  %s2013_s26 = scalar_lea.vmem (!%p2250_p4), [#allocation5], %s2009_s14 }
  0x75   : > { %1724 = dma.done.wait (%p2251_p3), %s272_s8, 512  }
  0x76   : > { %1726 = vsyncadd (%p2251_p3), %s272_s8, 4294966784  ;;  %s280_s22 = sand.u32 1, %s1827_s21   ;;  %s284_s13 = scalar_lea.vmem [#allocation8], %s2009_s14 }
  0x77   : > { %s281_s24 = scalar_lea.sflag [#allocation9], %s280_s22 }
  0x78   : > { %1728 = dma.done.wait (%p2251_p3), %s281_s24, 1024  }
  0x79   : > { %1730 = vsyncadd (%p2251_p3), %s281_s24, 4294966272  ;;  %vm362_vm0 = vcmask 64512   ;;  %v1764_v0 = vmov 0.0   ;;  %vm1765_vm1 = vmmov 0   ;;  %v375_v1 = vld [vmem:[%s284_s13] sm:$0xff]  ;;  %v376_v3 = vld [vmem:[%s284_s13 + $0x8] sm:$0xff] }
  0x7a   : > { %1427 = vmatprep.subr.mxu0 %v1764_v0  ;;  %363 = vst.msk [vmem:[#allocation4] sm:$0xff] %vm362_vm0, %v1764_v0  ;;  %364 = vst.msk [vmem:[#allocation4 + $0x8] sm:$0xff] %vm362_vm0, %v1764_v0  ;;  %1429 = vmatprep.mubr.msk.f32.mxu0 %vm1765_vm1, %v1764_v0  ;;  %v367_v2 = vld [vmem:[%s2013_s26] sm:$0xff]  ;;  %v368_v5 = vld [vmem:[%s2013_s26 + $0x8] sm:$0xff]  ;;  %vm353_vm2 = vcmask 7168   ;;  %v1766_v13 = vmov -inf  }
  0x7b   : > { %365 = vst.msk [vmem:[#allocation4 + $0x10] sm:$0xff] %vm362_vm0, %v1764_v0  ;;  %366 = vst.msk [vmem:[#allocation4 + $0x18] sm:$0xff] %vm362_vm0, %v1764_v0  ;;  %1432 = vmatprep.subr.mxu1 %v1764_v0  ;;  %1434 = vmatprep.mubr.msk.f32.mxu1 %vm1765_vm1, %v1764_v0  ;;  %v371_v4 = vmul.f32 0.35355338, %v367_v2  ;;  %v369_v6 = vld [vmem:[%s2013_s26 + $0x10] sm:$0xff]  ;;  %v370_v9 = vld [vmem:[%s2013_s26 + $0x18] sm:$0xff] }
  0x7c   : > { %1428 = vmatpush3.xpose.msk.msra.mxu0 %vm362_vm0, %v375_v1  ;;  %1433 = vmatpush3.xpose.msk.msra.mxu1 %vm362_vm0, %v376_v3  ;;  %v372_v7 = vmul.f32 0.35355338, %v368_v5  ;;  %v377_v8 = vld [vmem:[%s284_s13 + $0x10] sm:$0xff]  ;;  %v378_v10 = vld [vmem:[%s284_s13 + $0x18] sm:$0xff]  ;;  %v373_v11 = vmul.f32 0.35355338, %v369_v6 }
  0x7d   : > { %1437 = vmatprep.subr.mxu0 %v1764_v0  ;;  %1442 = vmatprep.subr.mxu1 %v1764_v0  ;;  %v374_v12 = vmul.f32 0.35355338, %v370_v9  ;;  %354 = vst.msk [vmem:[#allocation2] sm:$0xff] %vm353_vm2, %v1766_v13  ;;  %355 = vst.msk [vmem:[#allocation2 + $0x8] sm:$0xff] %vm353_vm2, %v1766_v13  ;;  %v1767_v26 = vmov 0   ;;  %s293_s21 = scalar_lea.vmem [#allocation10], %s2009_s14 }
  0x7e   : > { %356 = vst.msk [vmem:[#allocation2 + $0x10] sm:$0xff] %vm353_vm2, %v1766_v13  ;;  %357 = vst.msk [vmem:[#allocation2 + $0x18] sm:$0xff] %vm353_vm2, %v1766_v13  ;;  %1547 = vset.pattern.permute.xlu0 %v1767_v26  ;;  %1548 = vset.pattern.permute.xlu1 %v1767_v26  ;;  %v781_v39 = vld [vmem:[%s293_s21] sm:$0xff]  ;;  %v782_v40 = vld [vmem:[%s293_s21 + $0x8] sm:$0xff]  ;;  %s1388_s27 = sshll.u32 %s1749_s18, 2  ;;  %s325_s7 = scalar_lea.vmem [#allocation11], %s2009_s14 }
  0x7f   : > { %1430 = vmatmul.mubr.msk.f32.vlgmr.msra.gmra.mrb[0].mxu0 %vm362_vm0, %v371_v4  ;;  %1435 = vmatmul.mubr.msk.f32.vlgmr.msra.gmra.mrb[0].mxu1 %vm362_vm0, %v372_v7  ;;  %358 = vst.msk [vmem:[#allocation3] sm:$0xff] %vm353_vm2, %v1764_v0  ;;  %359 = vst.msk [vmem:[#allocation3 + $0x8] sm:$0xff] %vm353_vm2, %v1764_v0  ;;  %v783_v52 = vld [vmem:[%s293_s21 + $0x10] sm:$0xff]  ;;  %v784_v56 = vld [vmem:[%s293_s21 + $0x18] sm:$0xff]  ;;  %p341_p0 = scmp.lt.s32.totalorder %s1388_s27, 7  ;;  %s1199_s11 = sshll.u32 %s325_s7, 4  ;;  %s2160_s11 = int_to_ptr.vmem [resolvable:$true] %s1199_s11 }
  0x80   : > { %1438 = vmatpush3.xpose.msk.msra.mxu0 %vm362_vm0, %v377_v8  ;;  %1439 = vmatprep.mubr.msk.f32.mxu0 %vm1765_vm1, %v1764_v0  ;;  %360 = vst.msk [vmem:[#allocation3 + $0x10] sm:$0xff] %vm353_vm2, %v1764_v0  ;;  %361 = vst.msk [vmem:[#allocation3 + $0x18] sm:$0xff] %vm353_vm2, %v1764_v0  ;;  %s1410_s12 = sshll.u32 %s1749_s18, 9  ;;  %s1177_s6 = scalar_lea.sflag [#allocation7], %s2006_s25 }
  0x81   : > { %1443 = vmatpush3.xpose.msk.msra.mxu1 %vm362_vm0, %v378_v10  ;;  %1444 = vmatprep.mubr.msk.f32.mxu1 %vm1765_vm1, %v1764_v0  ;;  %s2265_s27 = smov (!%p341_p0, %s1388_s27), 7  ;;  %s2166_s23 = scalar_lea.hbm %s2219_s3, %s1410_s12 }
  0x82   : > { %1447 = vmatprep.subr.mxu0 %v1764_v0  ;;  %1452 = vmatprep.subr.mxu1 %v1764_v0  ;;  %s1389_s19 = sshll.u32 %s2265_s27, 3  ;;  %s1671_s10 = scalar_lea.vmem %s2160_s11, 512 }
  0x83   : > { %1440 = vmatmul.mubr.msk.f32.vlgmr.msra.gmra.mrb[2].mxu0 %vm362_vm0, %v373_v11  ;;  %s2138_s5 = scalar_lea.vmem %s2220_s4, %s1389_s19  ;;  %p1672_p10 = scmp.ne.s32.totalorder %s2160_s11, %s1671_s10 }
  0x84   : > { %1445 = vmatmul.mubr.msk.f32.vlgmr.msra.gmra.mrb[2].mxu1 %vm362_vm0, %v374_v12  ;;  %1449 = vmatprep.mubr.msk.f32.mxu0 %vm1765_vm1, %v1764_v0  ;;  %v2079_v27 = vld [vmem:[#allocation2] sm:$0xff]  ;;  %v685_v30 = vld [vmem:[#allocation2 + $0x8] sm:$0xff]  ;;  %p2252_p8 = scmp.ne.s32.totalorder %s2238_s28, 0  ;;  %s1768_s18 = smov [#allocation11]  }
  0x85   : > { %1454 = vmatprep.mubr.msk.f32.mxu1 %vm1765_vm1, %v1764_v0  ;;  %v2084_v31 = vld [vmem:[#allocation2 + $0x10] sm:$0xff]  ;;  %v2094_v36 = vld [vmem:[#allocation2 + $0x18] sm:$0xff]  ;;  %1448 = vmatpush3.msra.mxu0 %v781_v39  ;;  %s1675_s14 = sshll.u32 %s1768_s18, 4  ;;  %s1676_s14 = int_to_ptr.vmem [resolvable:$false] %s1675_s14 }
  0x86   : > { %1457 = vmatprep.subr.mxu0 %v1764_v0  ;;  %1453 = vmatpush3.msra.mxu1 %v782_v40  ;;  %v748_v11 = vld [vmem:[#allocation3] sm:$0xff]  ;;  %p1673_p9 = pnand %p1672_p10, %p2252_p8  ;;  %s1677_s8 = scalar_lea.vmem %s1676_s14, 1024 }
  0x87   : > { %1462 = vmatprep.subr.mxu1 %v1764_v0  ;;  %p1678_p1 = scmp.lt.s32.totalorder %s2160_s11, %s1676_s14  ;;  %p1679_p6 = scmp.lt.s32.totalorder %s1677_s8, %s1671_s10 }
  0x88   : > { %p1674_p12 = pneg %p1673_p9 }
  0x89   : > { %p1680_p13 = por %p1679_p6, %p1678_p1 }
  0x8b   : > { %p1681_p11 = pnand %p1680_p13, %p1674_p12 }
 0x152   : > { %v452_v14 = vpop.f32.mrb[0].mxu0  ;;  %v528_v15 = vpop.f32.mrb[0].mxu1 }
 0x153   : > { %v1431_v16 = vpop.f32.mrb[1].mxu0  ;;  %v688_v17 = vsel %vm362_vm0, %v452_v14, -inf  ;;  %v1436_v18 = vpop.f32.mrb[1].mxu1  ;;  %v691_v19 = vsel %vm362_vm0, %v528_v15, -inf }
 0x154   : > { %689 = vmax.xlane.f32.xlu0 %v688_v17  ;;  %v750_v18 = vld [vmem:[#allocation3 + $0x10] sm:$0xff] }
 0x156   : > { %v604_v20 = vpop.f32.mrb[2].mxu0 }
 0x157   : > { %v1441_v21 = vpop.f32.mrb[3].mxu0  ;;  %v694_v22 = vsel %vm362_vm0, %v604_v20, -inf  ;;  %v680_v23 = vpop.f32.mrb[2].mxu1 }
 0x158   : > { %692 = vmax.xlane.f32.xlu0 %v691_v19  ;;  %695 = vmax.xlane.f32.xlu1 %v694_v22  ;;  %v1446_v24 = vpop.f32.mrb[3].mxu1  ;;  %v697_v25 = vsel %vm362_vm0, %v680_v23, -inf  ;;  %v751_v22 = vld [vmem:[#allocation3 + $0x18] sm:$0xff] }
 0x15c   : > { %698 = vmax.xlane.f32.xlu1 %v697_v25 }
 0x1e1   : > { %v690_v28 = vpop.xlane.xlu0 %689 }
 0x1e2   : > { %v2082_v29 = vmax.f32 %v2079_v27, %v690_v28 }
 0x1e4   : > { %777 = vst.msk [vmem:[#allocation2] sm:$0xff] %vm353_vm2, %v2082_v29  ;;  %718 = vperm.xlu0 %1547, %v2082_v29   ;;  %v704_v63 = vsub.f32 %v2079_v27, %v2082_v29 }
 0x1e5   : > { %v693_v32 = vpop.xlane.xlu0 %692  ;;  %v696_v33 = vpop.xlane.xlu1 %695 }
 0x1e6   : > { %v2089_v34 = vmax.f32 %v685_v30, %v693_v32  ;;  %v2092_v35 = vmax.f32 %v2084_v31, %v696_v33  ;;  %v708_v3 = vmul.f32 1.442695, %v704_v63 }
 0x1e8   : > { %778 = vst.msk [vmem:[#allocation2 + $0x8] sm:$0xff] %vm353_vm2, %v2089_v34  ;;  %723 = vperm.xlu1 %1548, %v2089_v34   ;;  %779 = vst.msk [vmem:[#allocation2 + $0x10] sm:$0xff] %vm353_vm2, %v2092_v35  ;;  %v705_v60 = vsub.f32 %v685_v30, %v2089_v34 }
 0x1e9   : > { %v699_v37 = vpop.xlane.xlu1 %698 }
 0x1ea   : > { %v2102_v38 = vmax.f32 %v2094_v36, %v699_v37  ;;  %v710_v1 = vmul.f32 1.442695, %v705_v60  ;;  %v1078_v60 = vld [vmem:[#allocation4 + $0x8] sm:$0xff] }
 0x1ec   : > { %728 = vperm.xlu1 %1548, %v2092_v35   ;;  %780 = vst.msk [vmem:[#allocation2 + $0x18] sm:$0xff] %vm353_vm2, %v2102_v38  ;;  %v707_v5 = vsub.f32 %v2094_v36, %v2102_v38 }
 0x1ee   : > { %v714_v6 = vmul.f32 1.442695, %v707_v5 }
 0x1f0   : > { %733 = vperm.xlu1 %1548, %v2102_v38  }
 0x263   : > { %v719_v41 = vpop.permute.xlu0 %718 }
 0x264   : > { %v736_v42 = vsub.f32 %v452_v14, %v719_v41  ;;  %v749_v14 = vld [vmem:[#allocation3 + $0x8] sm:$0xff] }
 0x266   : > { %v740_v43 = vmul.f32 1.442695, %v736_v42 }
 0x267   : > { %v724_v44 = vpop.permute.xlu1 %723 }
 0x268   : > { %1549 = vpow2.f32 %v740_v43  ;;  %v737_v45 = vsub.f32 %v528_v15, %v724_v44 }
 0x26a   : > { %v742_v46 = vmul.f32 1.442695, %v737_v45 }
 0x26b   : > { %v729_v47 = vpop.permute.xlu1 %728 }
 0x26c   : > { %1551 = vpow2.f32 %v742_v46  ;;  %v738_v48 = vsub.f32 %v604_v20, %v729_v47 }
 0x26e   : > { %v744_v49 = vmul.f32 1.442695, %v738_v48 }
 0x26f   : > { %v734_v50 = vpop.permute.xlu1 %733 }
 0x270   : > { %1553 = vpow2.f32 %v744_v49  ;;  %v739_v51 = vsub.f32 %v680_v23, %v734_v50 }
 0x272   : > { %v1550_v53 = vpop.eup %1549  ;;  %v746_v54 = vmul.f32 1.442695, %v739_v51 }
 0x273   : > { %1450 = vmatmul.mubr.msk.f32.vlgmr.msra.gmra.mrb[4].mxu0 %vm362_vm0, %v1550_v53  ;;  %v756_v55 = vsel %vm362_vm0, %v1550_v53, 0.0 }
 0x274   : > { %1555 = vpow2.f32 %v746_v54  ;;  %757 = vadd.xlane.f32.xlu1 %v756_v55  ;;  %1458 = vmatpush3.msra.mxu0 %v783_v52 }
 0x275   : > { %1459 = vmatprep.mubr.msk.f32.mxu0 %vm1765_vm1, %v1764_v0  ;;  %1557 = vpow2.f32 %v710_v1 }
 0x276   : > { %v1552_v57 = vpop.eup %1551  ;;  %1559 = vpow2.f32 %v708_v3  ;;  %v1079_v3 = vld [vmem:[#allocation4 + $0x10] sm:$0xff] }
 0x277   : > { %1455 = vmatmul.mubr.msk.f32.vlgmr.msra.gmra.mrb[4].mxu1 %vm362_vm0, %v1552_v57  ;;  %v759_v58 = vsel %vm362_vm0, %v1552_v57, 0.0  ;;  %v1077_v57 = vld [vmem:[#allocation4] sm:$0xff] }
 0x278   : > { %760 = vadd.xlane.f32.xlu0 %v759_v58  ;;  %1463 = vmatpush3.msra.mxu1 %v784_v56 }
 0x279   : > { %1464 = vmatprep.mubr.msk.f32.mxu1 %vm1765_vm1, %v1764_v0  ;;  %v706_v0 = vsub.f32 %v2084_v31, %v2092_v35 }
 0x27a   : > { %v1554_v59 = vpop.eup %1553 }
 0x27b   : > { %1460 = vmatmul.mubr.msk.f32.vlgmr.msra.gmra.mrb[6].mxu0 %vm362_vm0, %v1554_v59  ;;  %v762_v61 = vsel %vm362_vm0, %v1554_v59, 0.0  ;;  %v712_v4 = vmul.f32 1.442695, %v706_v0 }
 0x27c   : > { %763 = vadd.xlane.f32.xlu1 %v762_v61 }
 0x27d   : > { %1561 = vpow2.f32 %v712_v4 }
 0x27e   : > { %v1556_v62 = vpop.eup %1555  ;;  %1563 = vpow2.f32 %v714_v6  ;;  %v1080_v6 = vld [vmem:[#allocation4 + $0x18] sm:$0xff] }
 0x27f   : > { %1465 = vmatmul.mubr.msk.f32.vlgmr.msra.gmra.mrb[6].mxu1 %vm362_vm0, %v1556_v62  ;;  %v765_v2 = vsel %vm362_vm0, %v1556_v62, 0.0  ;;  %v1558_v7 = vpop.eup %1557 }
 0x280   : > { %766 = vadd.xlane.f32.xlu1 %v765_v2  ;;  %v1560_v8 = vpop.eup %1559  ;;  %v753_v16 = vmul.f32 %v1558_v7, %v749_v14 }
 0x281   : > { %v752_v12 = vmul.f32 %v1560_v8, %v748_v11 }
 0x287   : > { %v1562_v9 = vpop.eup %1561 }
 0x288   : > { %v1564_v10 = vpop.eup %1563  ;;  %v754_v20 = vmul.f32 %v1562_v9, %v750_v18 }
 0x289   : > { %v755_v24 = vmul.f32 %v1564_v10, %v751_v22 }
 0x28e   : > { %1088 = vperm.xlu0 %1547, %v1558_v7  }
 0x291   : > { %1083 = vperm.xlu1 %1548, %v1560_v8  }
 0x295   : > { %1093 = vperm.xlu1 %1548, %v1562_v9  }
 0x299   : > { %1098 = vperm.xlu1 %1548, %v1564_v10  }
 0x301   : > { %v758_v13 = vpop.xlane.xlu1 %757 }
 0x302   : > { %v768_v15 = vadd.f32 %v758_v13, %v752_v12 }
 0x304   : > { %773 = vst.msk [vmem:[#allocation3] sm:$0xff] %vm353_vm2, %v768_v15  ;;  %1565 = vrcp.f32 %v768_v15 }
 0x305   : > { %1567 = vlog2.f32 %v768_v15  ;;  %v761_v17 = vpop.xlane.xlu0 %760 }
 0x306   : > { %v769_v19 = vadd.f32 %v761_v17, %v753_v16 }
 0x308   : > { %774 = vst.msk [vmem:[#allocation3 + $0x8] sm:$0xff] %vm353_vm2, %v769_v19  ;;  %1569 = vrcp.f32 %v769_v19 }
 0x309   : > { %1571 = vlog2.f32 %v769_v19  ;;  %v764_v21 = vpop.xlane.xlu1 %763 }
 0x30a   : > { %v770_v23 = vadd.f32 %v764_v21, %v754_v20 }
 0x30c   : > { %775 = vst.msk [vmem:[#allocation3 + $0x10] sm:$0xff] %vm353_vm2, %v770_v23  ;;  %1573 = vrcp.f32 %v770_v23 }
 0x30d   : > { %1575 = vlog2.f32 %v770_v23  ;;  %v767_v25 = vpop.xlane.xlu1 %766  ;;  %v1089_v61 = vpop.permute.xlu0 %1088 }
 0x30e   : > { %v1566_v26 = vpop.eup %1565  ;;  %v771_v27 = vadd.f32 %v767_v25, %v755_v24  ;;  %v1102_v2 = vmul.f32 %v1089_v61, %v1078_v60 }
 0x30f   : > { %v1568_v28 = vpop.eup %1567  ;;  %v1120_v30 = vmul.f32 %v1566_v26, %v768_v15 }
 0x310   : > { %v1161_v31 = vmul.f32 0.6931472, %v1568_v28  ;;  %776 = vst.msk [vmem:[#allocation3 + $0x18] sm:$0xff] %vm353_vm2, %v771_v27  ;;  %1577 = vrcp.f32 %v771_v27 }
 0x311   : > { %1579 = vlog2.f32 %v771_v27  ;;  %v1124_v32 = vsub.f32 2.0, %v1120_v30  ;;  %v1084_v58 = vpop.permute.xlu1 %1083 }
 0x312   : > { %v1570_v33 = vpop.eup %1569  ;;  %v1168_v36 = vadd.f32 %v1161_v31, %v2082_v29  ;;  %v1101_v59 = vmul.f32 %v1084_v58, %v1077_v57 }
 0x313   : > { %v1572_v37 = vpop.eup %1571  ;;  %v1128_v39 = vmul.f32 %v1566_v26, %v1124_v32  ;;  %v1121_v40 = vmul.f32 %v1570_v33, %v769_v19 }
 0x314   : > { %1172 = vst.msk [vmem:[%s2138_s5] sm:$0xff] %vm353_vm2, %v1168_v36  ;;  %v1163_v41 = vmul.f32 0.6931472, %v1572_v37 }
 0x315   : > { %1134 = vperm.xlu1 %1548, %v1128_v39   ;;  %v1125_v42 = vsub.f32 2.0, %v1121_v40  ;;  %v1094_v1 = vpop.permute.xlu1 %1093 }
 0x316   : > { %v1574_v43 = vpop.eup %1573  ;;  %v1169_v44 = vadd.f32 %v1163_v41, %v2089_v34  ;;  %v1103_v5 = vmul.f32 %v1094_v1, %v1079_v3 }
 0x317   : > { %v1576_v45 = vpop.eup %1575  ;;  %v1129_v46 = vmul.f32 %v1570_v33, %v1125_v42  ;;  %v1122_v47 = vmul.f32 %v1574_v43, %v770_v23 }
 0x318   : > { %1173 = vst.msk [vmem:[%s2138_s5 + $0x8] sm:$0xff] %vm353_vm2, %v1169_v44  ;;  %v1165_v48 = vmul.f32 0.6931472, %v1576_v45 }
 0x319   : > { %1139 = vperm.xlu0 %1547, %v1129_v46   ;;  %v1126_v29 = vsub.f32 2.0, %v1122_v47  ;;  %v1099_v7 = vpop.permute.xlu1 %1098 }
 0x31a   : > { %v1578_v49 = vpop.eup %1577  ;;  %v1170_v50 = vadd.f32 %v1165_v48, %v2092_v35  ;;  %v1104_v11 = vmul.f32 %v1099_v7, %v1080_v6 }
 0x31b   : > { %v1580_v51 = vpop.eup %1579  ;;  %v1130_v52 = vmul.f32 %v1574_v43, %v1126_v29  ;;  %v1123_v53 = vmul.f32 %v1578_v49, %v771_v27 }
 0x31c   : > { %1174 = vst.msk [vmem:[%s2138_s5 + $0x10] sm:$0xff] %vm353_vm2, %v1170_v50  ;;  %v1167_v54 = vmul.f32 0.6931472, %v1580_v51 }
 0x31d   : > { %1144 = vperm.xlu1 %1548, %v1130_v52   ;;  %v1127_v34 = vsub.f32 2.0, %v1123_v53 }
 0x31e   : > { %v1171_v55 = vadd.f32 %v1167_v54, %v2102_v38 }
 0x31f   : > { %v1131_v56 = vmul.f32 %v1578_v49, %v1127_v34 }
 0x320   : > { %1175 = vst.msk [vmem:[%s2138_s5 + $0x18] sm:$0xff] %vm353_vm2, %v1171_v55 }
 0x321   : > { %1149 = vperm.xlu0 %1547, %v1131_v56  }
 0x346   : > { %v854_v35 = vpop.f32.mrb[4].mxu0 }
 0x347   : > { %v1105_v62 = vadd.f32 %v1101_v59, %v854_v35  ;;  %v1451_v63 = vpop.f32.mrb[5].mxu0 }
 0x349   : > { %1109 = vst.msk [vmem:[#allocation4] sm:$0xff] %vm362_vm0, %v1105_v62 }
 0x34a   : > { %v927_v0 = vpop.f32.mrb[4].mxu1 }
 0x34b   : > { %v1106_v4 = vadd.f32 %v1102_v2, %v927_v0  ;;  %v1456_v38 = vpop.f32.mrb[5].mxu1 }
 0x34d   : > { %1110 = vst.msk [vmem:[#allocation4 + $0x8] sm:$0xff] %vm362_vm0, %v1106_v4 }
 0x34e   : > { %v1000_v8 = vpop.f32.mrb[6].mxu0 }
 0x34f   : > { %v1107_v9 = vadd.f32 %v1103_v5, %v1000_v8  ;;  %v1461_v10 = vpop.f32.mrb[7].mxu0 }
 0x351   : > { %1111 = vst.msk [vmem:[#allocation4 + $0x10] sm:$0xff] %vm362_vm0, %v1107_v9 }
 0x352   : > { %v1073_v12 = vpop.f32.mrb[6].mxu1 }
 0x353   : > { %v1108_v13 = vadd.f32 %v1104_v11, %v1073_v12  ;;  %v1466_v14 = vpop.f32.mrb[7].mxu1 }
 0x355   : > { %1112 = vst.msk [vmem:[#allocation4 + $0x18] sm:$0xff] %vm362_vm0, %v1108_v13 }
 0x394   : > { %v1135_v15 = vpop.permute.xlu1 %1134 }
 0x395   : > { %v1152_v16 = vmul.f32 %v1135_v15, %v1105_v62 }
 0x397   : > { %1156 = vst.msk [vmem:[%s325_s7] sm:$0xff] %vm362_vm0, %v1152_v16 }
 0x398   : > { %v1140_v17 = vpop.permute.xlu0 %1139 }
 0x399   : > { %v1153_v18 = vmul.f32 %v1140_v17, %v1106_v4 }
 0x39b   : > { %1157 = vst.msk [vmem:[%s325_s7 + $0x8] sm:$0xff] %vm362_vm0, %v1153_v18 }
 0x39c   : > { %v1145_v19 = vpop.permute.xlu1 %1144 }
 0x39d   : > { %v1154_v20 = vmul.f32 %v1145_v19, %v1107_v9 }
 0x39f   : > { %1158 = vst.msk [vmem:[%s325_s7 + $0x10] sm:$0xff] %vm362_vm0, %v1154_v20 }
 0x3a0   : > { %v1150_v21 = vpop.permute.xlu0 %1149 }
 0x3a1   : > { %v1155_v22 = vmul.f32 %v1150_v21, %v1108_v13 }
 0x3a3   : > { %1159 = vst.msk [vmem:[%s325_s7 + $0x18] sm:$0xff] %vm362_vm0, %v1155_v22 }
 0x3a4   : > { %1684 = shalt.err (!%p1681_p11)
}
 0x3a5   : > { %s1685_s26 = scalar_lea.hbm %s2166_s23, 512  ;;  %s1689_s13 = scalar_lea.hbm %s2219_s3, 1024 }
 0x3a6   : > { %p1686_p2 = scmp.ne.s32.totalorder %s2166_s23, %s1685_s26  ;;  %p1690_p4 = scmp.lt.u32.totalorder %s2166_s23, %s2219_s3 }
 0x3a7   : > { %p1691_p3 = scmp.lt.u32.totalorder %s1689_s13, %s1685_s26  ;;  %p1693_p10 = scmp.lt.u32.totalorder %s1685_s26, %s2166_s23 }
 0x3a8   : > { %p1687_p5 = pnand %p1686_p2, %p2252_p8 }
 0x3a9   : > { %p1692_p0 = por %p1691_p3, %p1690_p4 }
 0x3aa   : > { %p1688_p7 = pneg %p1687_p5 }
 0x3ab   : > { %p1694_p9 = por %p1693_p10, %p1692_p0 }
 0x3ad   : > { %p1695_p12 = pnand %p1694_p9, %p1688_p7 }
 0x3af   : > { %1698 = shalt.err (!%p1695_p12)
}
 0x3b0   : > { %s1769_s19 = smov 128   ;;  %s1770_s29 = smov 8  }
 0x3b1   : > { %1473 = dma.vmem_to_hbm [thread:$0]  (%p2252_p8), %s2160_s11, 512, %s2166_s23, %s1177_s6, %s1769_s19, %s1769_s19, %s1770_s29  }
 0x3b2 PF: > { %s2253_s9 = sld [smem:[#allocation16_spill]]  ;;  %s1218_s5 = sand.u32 1, %s1737_s15  }
 0x3b3   : > { %p2254_p1 = scmp.ne.s32.totalorder %s2240_s30, 0  ;;  %s1219_s7 = scalar_lea.sflag [#allocation7], %s1218_s5 }
 0x3b8   : > { %p2255_p6 = scmp.ge.s32.totalorder %s2253_s9, 2 }
 0x3ba   : > { %p1486_p13 = pnand %p2255_p6, %p2254_p1 }
 0x3bc   : > { %1732 = dma.done.wait (!%p1486_p13), %s1219_s7, 512  }
 0x3bd   : > { %1734 = vsyncadd (!%p1486_p13), %s1219_s7, 4294966784  ;;  %s24_s20 = sadd.s32 1, %s2253_s9   ;;  %s2256_s12 = sld [smem:[#allocation18_spill]] }
 0x3be   : > { %p21_p11 = scmp.ge.s32.totalorder %s24_s20, 4   ;;  %s2257_s18 = sld [smem:[#allocation15_spill]] }
 0x3bf   : > { %s2258_s19 = sld [smem:[#allocation17_spill]]  ;;  %s2259_s15 = smov %s1741_s16 }
 0x3c0   : > { %s2260_s16 = smov %s1745_s17  ;;  %23 = sbr.rel (!%p21_p11) target bundleno = 10 (0xa), region = 121 }
 0x3c3   : > { %s2261_s17 = smov %s2256_s12 }
 0x3c7   :  { %1235 = vsyncpa [#allocation6], 1 }
 0x3c8   :  { %1237 = vsyncpa [#allocation6 + $0x1], 1 }
 0x3c9   :  { %1238 = vsyncpa [#allocation9], 1 }
 0x3ca   :  { %1240 = vsyncpa [#allocation9 + $0x1], 1 }
 0x3cb   :  { %1241 = vsyncpa [#allocation7], 1 }
 0x3cc   :  { %1243 = vsyncpa [#allocation7 + $0x1], 1 }

</bundles_post_ra>
